<compile_context>
chip_gen: v7x
topology: tpu7x:2x2x1
jax: 0.10.0
libtpu: 0.0.40
codegen_flags: <defaults>
</compile_context>

<pallas_src>
import math

import jax
import jax.numpy as jnp
from jax.experimental import pallas as pl
from jax.experimental.pallas import tpu as pltpu

VOCAB = 768          # fixed by the module: nn.Linear(hidden_size, 768)
LN_EPS = 1e-12       # config.layer_norm_eps (BERT default)
INV_SQRT2 = 0.7071067811865476


def _round_up(x, m):
    return (x + m - 1) // m * m


def _vmem_limit_bytes():
    """~75% of physical VMEM, capped at 96 MiB (48 MiB on v7x, 96 MiB on v5e/v6e)."""
    try:
        cap = int(pltpu.get_tpu_info().vmem_capacity_bytes)
    except Exception:
        cap = 128 * 1024 * 1024
    return min(int(cap * 3 // 4), 96 * 1024 * 1024)


def _mlm_head_kernel(x_ref, w1_ref, vecs_ref, w2_ref, b2_ref, o_ref):
    # x_ref: (TM, H) f32 tile (cast to bf16 here, inside the pipelined kernel).
    # w1_ref: (H, H) bf16; vecs_ref: (3, H) f32 = [b1; gamma; beta];
    # w2_ref: (H, VOCAB) bf16; b2_ref: (1, VOCAB) f32.
    x = x_ref[...].astype(jnp.bfloat16)

    # dense: bf16 x bf16 on the MXU, f32 accumulation; bias folded into the epilogue.
    h = jnp.dot(x, w1_ref[...], preferred_element_type=jnp.float32)

    vecs = vecs_ref[...]
    h = h + vecs[0:1, :]

    # erf-GELU in f32 (erf rides the EUP; constant multiply instead of divide).
    h = h * (0.5 * (1.0 + jax.lax.erf(h * INV_SQRT2)))

    # LayerNorm over the hidden dim (biased variance, like nn.LayerNorm), f32 math.
    mu = jnp.mean(h, axis=-1, keepdims=True)
    var = jnp.mean(jnp.square(h - mu), axis=-1, keepdims=True)
    h = (h - mu) * jax.lax.rsqrt(var + LN_EPS)
    h = h * vecs[1:2, :] + vecs[2:3, :]

    # decoder: bf16 x bf16 matmul, f32 accumulation, f32 bias add.
    y = jnp.dot(h.astype(jnp.bfloat16), w2_ref[...], preferred_element_type=jnp.float32)
    y = y + b2_ref[...]
    o_ref[...] = y.astype(o_ref.dtype)


def visual_only_mlm_head(sequence_output, params, tm=512):
    """sequence_output: (B, S, H) float32. Returns (B, S, 768) in the input dtype."""
    B, S, H = sequence_output.shape
    M = B * S

    # Input stays f32 — the bf16 cast happens inside the kernel (no extra HBM pass).
    x2d = sequence_output.reshape(M, H)

    # Row tile: multiple of 16 (bf16 sublane tile), capped at `tm`, and clamped so the
    # grid has at least 2 steps when M allows (keeps both v7x TensorCores busy).
    TM = max(16, min(tm, _round_up(pl.cdiv(M, 2), 16)))
    M_pad = _round_up(M, TM)
    if M_pad != M:
        # Fallback copy only when the row count doesn't tile evenly.
        x2d = jnp.pad(x2d, ((0, M_pad - M), (0, 0)))

    # Weights in bf16 for MXU residency; biases / LN affine stay f32 and are packed
    # into a single (3, H) operand: [b1; gamma; beta].
    w1 = params["w1"].astype(jnp.bfloat16)
    w2 = params["w2"].astype(jnp.bfloat16)
    ln_vecs = jnp.concatenate([params["b1"], params["gamma"], params["beta"]], axis=0)

    grid = (M_pad // TM,)

    bytes_accessed = (
        M_pad * H * 4                      # f32 activation read
        + (H * H + H * VOCAB) * 2          # bf16 weights
        + (3 * H + VOCAB) * 4              # packed LN vectors + decoder bias
        + M_pad * VOCAB * 4                # f32 output write
    )
    cost = pl.CostEstimate(
        flops=2 * M_pad * H * (H + VOCAB),
        transcendentals=M_pad * H,
        bytes_accessed=bytes_accessed,
    )

    def build(resident_mode):
        def resident_spec(shape):
            idx = lambda i, _n=len(shape): (0,) * _n
            if resident_mode is None:
                return pl.BlockSpec(shape, idx)
            return pl.BlockSpec(shape, idx, pipeline_mode=resident_mode)

        return pl.pallas_call(
            _mlm_head_kernel,
            out_shape=jax.ShapeDtypeStruct((M_pad, VOCAB), sequence_output.dtype),
            grid_spec=pltpu.PrefetchScalarGridSpec(
                num_scalar_prefetch=0,
                grid=grid,
                in_specs=[
                    pl.BlockSpec((TM, H), lambda i: (i, 0)),   # x tile (pipelined)
                    resident_spec((H, H)),                     # W1 (resident)
                    resident_spec((3, H)),                     # [b1; gamma; beta]
                    resident_spec((H, VOCAB)),                 # W2 (resident)
                    resident_spec((1, VOCAB)),                 # b2
                ],
                out_specs=pl.BlockSpec((TM, VOCAB), lambda i: (i, 0)),
            ),
            compiler_params=pltpu.CompilerParams(
                dimension_semantics=("parallel",),     # shard row tiles across TCs
                vmem_limit_bytes=_vmem_limit_bytes(),  # generation-gated budget
            ),
            cost_estimate=cost,
        )

    args = (x2d, w1, ln_vecs, w2, params["b2"])
    try:
        # Constant-index operands never change -> single buffer saves VMEM.
        out2d = build(pl.Buffered(1))(*args)
    except Exception:
        # Fallback if the installed jax does not lower buffer_count=1.
        out2d = build(None)(*args)

    if M_pad != M:
        out2d = out2d[:M]
    return out2d.reshape(B, S, VOCAB)


def init_params(key, hidden):
    """Deterministic synthetic parameter init (shapes per the module __init__)."""
    k1, k2, k3 = jax.random.split(key, 3)
    scale1 = 1.0 / math.sqrt(hidden)
    return {
        # dense: nn.Linear(H, H) -> stored transposed as (in, out)
        "w1": jax.random.uniform(k1, (hidden, hidden), jnp.float32, -scale1, scale1),
        "b1": jax.random.uniform(k2, (1, hidden), jnp.float32, -scale1, scale1),
        # LayerNorm(H): gamma=1, beta=0
        "gamma": jnp.ones((1, hidden), jnp.float32),
        "beta": jnp.zeros((1, hidden), jnp.float32),
        # decoder: nn.Linear(H, 768, bias=False) + tied zeros bias Parameter
        "w2": jax.random.uniform(k3, (hidden, VOCAB), jnp.float32, -scale1, scale1),
        "b2": jnp.zeros((1, VOCAB), jnp.float32),
    }


def _reference_f32(x2d, params):
    """Pure-f32 JAX reference (original PyTorch semantics)."""
    h = x2d @ params["w1"] + params["b1"][0]
    h = h * 0.5 * (1.0 + jax.lax.erf(h / jnp.sqrt(2.0)))
    mu = jnp.mean(h, axis=-1, keepdims=True)
    var = jnp.mean(jnp.square(h - mu), axis=-1, keepdims=True)
    h = (h - mu) * jax.lax.rsqrt(var + LN_EPS) * params["gamma"][0] + params["beta"][0]
    return h @ params["w2"] + params["b2"][0]


def _reference_bf16(x2d, params):
    """Reference mirroring the kernel's bf16-operand / f32-accumulate matmuls."""
    xb = x2d.astype(jnp.bfloat16)
    w1b = params["w1"].astype(jnp.bfloat16)
    w2b = params["w2"].astype(jnp.bfloat16)
    h = jnp.dot(xb, w1b, preferred_element_type=jnp.float32) + params["b1"][0]
    h = h * (0.5 * (1.0 + jax.lax.erf(h * INV_SQRT2)))
    mu = jnp.mean(h, axis=-1, keepdims=True)
    var = jnp.mean(jnp.square(h - mu), axis=-1, keepdims=True)
    h = (h - mu) * jax.lax.rsqrt(var + LN_EPS) * params["gamma"][0] + params["beta"][0]
    return jnp.dot(h.astype(jnp.bfloat16), w2b, preferred_element_type=jnp.float32) + params["b2"][0]


if __name__ == "__main__":
    B, S, H = 2, 8, 32
    key = jax.random.PRNGKey(0)
    kx, kp = jax.random.split(key)

    sequence_output = jax.random.normal(kx, (B, S, H), jnp.float32)
    params = init_params(kp, H)

    out = visual_only_mlm_head(sequence_output, params)
    out = jax.block_until_ready(out)
    assert out.shape == (B, S, VOCAB), out.shape

    x2d = sequence_output.reshape(B * S, H)
    ref_tight = _reference_bf16(x2d, params).reshape(B, S, VOCAB)
    ref_f32 = _reference_f32(x2d, params).reshape(B, S, VOCAB)

    # Tight check vs. the bf16-matmul reference (same numerics as the kernel).
    assert jnp.allclose(out, ref_tight, atol=1e-3, rtol=1e-3), float(
        jnp.max(jnp.abs(out - ref_tight))
    )
    # Loose sanity check vs. the exact f32 PyTorch-semantics reference
    # (bf16 MXU operands introduce ~1e-2-level deviation by design).
    assert jnp.allclose(out, ref_f32, atol=5e-2, rtol=5e-2), float(
        jnp.max(jnp.abs(out - ref_f32))
    )

    print("KERNEL_OK")
</pallas_src>

<mosaic_0001>
module attributes {stable_mosaic.version = 11 : i64} {
  func.func @_mlm_head_kernel(%arg0: i32, %arg1: memref<16x32xf32, #tpu.memory_space<vmem>>, %arg2: memref<32x32xbf16, #tpu.memory_space<vmem>>, %arg3: memref<3x32xf32, #tpu.memory_space<vmem>>, %arg4: memref<32x768xbf16, #tpu.memory_space<vmem>>, %arg5: memref<1x768xf32, #tpu.memory_space<vmem>>, %arg6: memref<16x768xf32, #tpu.memory_space<vmem>>) attributes {dimension_semantics = [#tpu.dimension_semantics<parallel>], iteration_bounds = array<i64: 1>, scalar_prefetch = 0 : i64, scratch_operands = 0 : i64, tpu.core_type = #tpu.core_type<tc>, window_params = [{transform_indices = @transform_0, window_bounds = array<i64: 16, 32>}, {pipeline_mode = #tpu.pipeline_mode<synchronous>, transform_indices = @transform_1, window_bounds = array<i64: 32, 32>}, {pipeline_mode = #tpu.pipeline_mode<synchronous>, transform_indices = @transform_2, window_bounds = array<i64: 3, 32>}, {pipeline_mode = #tpu.pipeline_mode<synchronous>, transform_indices = @transform_3, window_bounds = array<i64: 32, 768>}, {pipeline_mode = #tpu.pipeline_mode<synchronous>, transform_indices = @transform_4, window_bounds = array<i64: 1, 768>}, {transform_indices = @transform_5, window_bounds = array<i64: 16, 768>}]} {
    %c0 = arith.constant 0 : index
    %c0_0 = arith.constant 0 : index
    %0 = vector.load %arg1[%c0, %c0_0] : memref<16x32xf32, #tpu.memory_space<vmem>>, vector<16x32xf32>
    %1 = arith.truncf %0 : vector<16x32xf32> to vector<16x32xbf16>
    %c0_1 = arith.constant 0 : index
    %c0_2 = arith.constant 0 : index
    %2 = vector.load %arg2[%c0_1, %c0_2] : memref<32x32xbf16, #tpu.memory_space<vmem>>, vector<32x32xbf16>
    %cst = arith.constant dense<0.000000e+00> : vector<16x32xf32>
    %3 = tpu.matmul %1, %2, %cst {dimension_numbers = #tpu.dot_dimension_numbers<[1], [0], [0], [1], [0, 0, 1, 1], [], []>} : vector<16x32xbf16>, vector<32x32xbf16>, vector<16x32xf32> -> vector<16x32xf32>
    %c0_3 = arith.constant 0 : index
    %c0_4 = arith.constant 0 : index
    %4 = vector.load %arg3[%c0_3, %c0_4] : memref<3x32xf32, #tpu.memory_space<vmem>>, vector<3x32xf32>
    %5 = vector.extract_strided_slice %4 {offsets = [0, 0], sizes = [1, 32], strides = [1, 1]} : vector<3x32xf32> to vector<1x32xf32>
    %6 = vector.broadcast %5 : vector<1x32xf32> to vector<16x32xf32>
    %7 = arith.addf %3, %6 : vector<16x32xf32>
    %cst_5 = arith.constant 0.707106769 : f32
    %8 = vector.broadcast %cst_5 : f32 to vector<16x32xf32>
    %9 = arith.mulf %7, %8 : vector<16x32xf32>
    %10 = math.erf %9 : vector<16x32xf32>
    %cst_6 = arith.constant 1.000000e+00 : f32
    %11 = vector.broadcast %cst_6 : f32 to vector<16x32xf32>
    %12 = arith.addf %11, %10 : vector<16x32xf32>
    %cst_7 = arith.constant 5.000000e-01 : f32
    %13 = vector.broadcast %cst_7 : f32 to vector<16x32xf32>
    %14 = arith.mulf %13, %12 : vector<16x32xf32>
    %15 = arith.mulf %7, %14 : vector<16x32xf32>
    %cst_8 = arith.constant dense<0.000000e+00> : vector<16xf32>
    %16 = vector.multi_reduction <add>, %15, %cst_8 [1] : vector<16x32xf32> to vector<16xf32>
    %17 = vector.shape_cast %16 : vector<16xf32> to vector<16x1xf32>
    %cst_9 = arith.constant 3.200000e+01 : f32
    %18 = vector.broadcast %cst_9 : f32 to vector<16x1xf32>
    %19 = arith.divf %17, %18 : vector<16x1xf32>
    %20 = vector.broadcast %19 : vector<16x1xf32> to vector<16x32xf32>
    %21 = arith.subf %15, %20 : vector<16x32xf32>
    %22 = arith.mulf %21, %21 : vector<16x32xf32>
    %cst_10 = arith.constant dense<0.000000e+00> : vector<16xf32>
    %23 = vector.multi_reduction <add>, %22, %cst_10 [1] : vector<16x32xf32> to vector<16xf32>
    %24 = vector.shape_cast %23 : vector<16xf32> to vector<16x1xf32>
    %cst_11 = arith.constant 3.200000e+01 : f32
    %25 = vector.broadcast %cst_11 : f32 to vector<16x1xf32>
    %26 = arith.divf %24, %25 : vector<16x1xf32>
    %27 = vector.broadcast %19 : vector<16x1xf32> to vector<16x32xf32>
    %28 = arith.subf %15, %27 : vector<16x32xf32>
    %cst_12 = arith.constant 9.99999996E-13 : f32
    %29 = vector.broadcast %cst_12 : f32 to vector<16x1xf32>
    %30 = arith.addf %26, %29 : vector<16x1xf32>
    %31 = math.rsqrt %30 : vector<16x1xf32>
    %32 = vector.broadcast %31 : vector<16x1xf32> to vector<16x32xf32>
    %33 = arith.mulf %28, %32 : vector<16x32xf32>
    %34 = vector.extract_strided_slice %4 {offsets = [1, 0], sizes = [1, 32], strides = [1, 1]} : vector<3x32xf32> to vector<1x32xf32>
    %35 = vector.broadcast %34 : vector<1x32xf32> to vector<16x32xf32>
    %36 = arith.mulf %33, %35 : vector<16x32xf32>
    %37 = vector.extract_strided_slice %4 {offsets = [2, 0], sizes = [1, 32], strides = [1, 1]} : vector<3x32xf32> to vector<1x32xf32>
    %38 = vector.broadcast %37 : vector<1x32xf32> to vector<16x32xf32>
    %39 = arith.addf %36, %38 : vector<16x32xf32>
    %40 = arith.truncf %39 : vector<16x32xf32> to vector<16x32xbf16>
    %c0_13 = arith.constant 0 : index
    %c0_14 = arith.constant 0 : index
    %41 = vector.load %arg4[%c0_13, %c0_14] : memref<32x768xbf16, #tpu.memory_space<vmem>>, vector<32x768xbf16>
    %cst_15 = arith.constant dense<0.000000e+00> : vector<16x768xf32>
    %42 = tpu.matmul %40, %41, %cst_15 {dimension_numbers = #tpu.dot_dimension_numbers<[1], [0], [0], [1], [0, 0, 1, 1], [], []>} : vector<16x32xbf16>, vector<32x768xbf16>, vector<16x768xf32> -> vector<16x768xf32>
    %c0_16 = arith.constant 0 : index
    %c0_17 = arith.constant 0 : index
    %43 = vector.load %arg5[%c0_16, %c0_17] : memref<1x768xf32, #tpu.memory_space<vmem>>, vector<1x768xf32>
    %44 = vector.broadcast %43 : vector<1x768xf32> to vector<16x768xf32>
    %45 = arith.addf %42, %44 : vector<16x768xf32>
    %c0_18 = arith.constant 0 : index
    %c0_19 = arith.constant 0 : index
    %46 = vector.load %arg6[%c0_18, %c0_19] : memref<16x768xf32, #tpu.memory_space<vmem>>, vector<16x768xf32>
    tpu.vector_store %arg6[%c0_18, %c0_19], %45 {strides = array<i32>} : memref<16x768xf32, #tpu.memory_space<vmem>>, vector<16x768xf32>,
    return
  }
  func.func @transform_0(%arg0: i32) -> (i32, i32) {
    %c0_i32 = arith.constant 0 : i32
    %c0_i32_0 = arith.constant 0 : i32
    return %arg0, %c0_i32 : i32, i32
  }
  func.func @transform_1(%arg0: i32) -> (i32, i32) {
    %c0_i32 = arith.constant 0 : i32
    %c0_i32_0 = arith.constant 0 : i32
    %c0_i32_1 = arith.constant 0 : i32
    return %c0_i32, %c0_i32_0 : i32, i32
  }
  func.func @transform_2(%arg0: i32) -> (i32, i32) {
    %c0_i32 = arith.constant 0 : i32
    %c0_i32_0 = arith.constant 0 : i32
    %c0_i32_1 = arith.constant 0 : i32
    return %c0_i32, %c0_i32_0 : i32, i32
  }
  func.func @transform_3(%arg0: i32) -> (i32, i32) {
    %c0_i32 = arith.constant 0 : i32
    %c0_i32_0 = arith.constant 0 : i32
    %c0_i32_1 = arith.constant 0 : i32
    return %c0_i32, %c0_i32_0 : i32, i32
  }
  func.func @transform_4(%arg0: i32) -> (i32, i32) {
    %c0_i32 = arith.constant 0 : i32
    %c0_i32_0 = arith.constant 0 : i32
    %c0_i32_1 = arith.constant 0 : i32
    return %c0_i32, %c0_i32_0 : i32, i32
  }
  func.func @transform_5(%arg0: i32) -> (i32, i32) {
    %c0_i32 = arith.constant 0 : i32
    %c0_i32_0 = arith.constant 0 : i32
    return %arg0, %c0_i32 : i32, i32
  }
}

module attributes {stable_mosaic.version = 11 : i64} {
  func.func @_mlm_head_kernel(%arg0: i32, %arg1: memref<16x32xf32, #tpu.memory_space<vmem>>, %arg2: memref<32x32xbf16, #tpu.memory_space<vmem>>, %arg3: memref<3x32xf32, #tpu.memory_space<vmem>>, %arg4: memref<32x768xbf16, #tpu.memory_space<vmem>>, %arg5: memref<1x768xf32, #tpu.memory_space<vmem>>, %arg6: memref<16x768xf32, #tpu.memory_space<vmem>>) attributes {dimension_semantics = [#tpu.dimension_semantics<parallel>], iteration_bounds = array<i64: 1>, scalar_prefetch = 0 : i64, scratch_operands = 0 : i64, tpu.core_type = #tpu.core_type<tc>, window_params = [{transform_indices = @transform_0, window_bounds = array<i64: 16, 32>}, {pipeline_mode = #tpu.pipeline_mode<synchronous>, transform_indices = @transform_1, window_bounds = array<i64: 32, 32>}, {pipeline_mode = #tpu.pipeline_mode<synchronous>, transform_indices = @transform_2, window_bounds = array<i64: 3, 32>}, {pipeline_mode = #tpu.pipeline_mode<synchronous>, transform_indices = @transform_3, window_bounds = array<i64: 32, 768>}, {pipeline_mode = #tpu.pipeline_mode<synchronous>, transform_indices = @transform_4, window_bounds = array<i64: 1, 768>}, {transform_indices = @transform_5, window_bounds = array<i64: 16, 768>}]} {
    %c0 = arith.constant 0 : index
    %c0_0 = arith.constant 0 : index
    %0 = vector.load %arg1[%c0, %c0_0] : memref<16x32xf32, #tpu.memory_space<vmem>>, vector<16x32xf32>
    %1 = arith.truncf %0 : vector<16x32xf32> to vector<16x32xbf16>
    %c0_1 = arith.constant 0 : index
    %c0_2 = arith.constant 0 : index
    %2 = vector.load %arg2[%c0_1, %c0_2] : memref<32x32xbf16, #tpu.memory_space<vmem>>, vector<32x32xbf16>
    %cst = arith.constant dense<0.000000e+00> : vector<16x32xf32>
    %3 = tpu.matmul %1, %2, %cst {dimension_numbers = #tpu.dot_dimension_numbers<[1], [0], [0], [1], [0, 0, 1, 1], [], []>} : vector<16x32xbf16>, vector<32x32xbf16>, vector<16x32xf32> -> vector<16x32xf32>
    %c0_3 = arith.constant 0 : index
    %c0_4 = arith.constant 0 : index
    %4 = vector.load %arg3[%c0_3, %c0_4] : memref<3x32xf32, #tpu.memory_space<vmem>>, vector<3x32xf32>
    %5 = vector.extract_strided_slice %4 {offsets = [0, 0], sizes = [1, 32], strides = [1, 1]} : vector<3x32xf32> to vector<1x32xf32>
    %6 = vector.broadcast %5 : vector<1x32xf32> to vector<16x32xf32>
    %7 = arith.addf %3, %6 : vector<16x32xf32>
    %cst_5 = arith.constant 0.707106769 : f32
    %8 = vector.broadcast %cst_5 : f32 to vector<16x32xf32>
    %9 = arith.mulf %7, %8 : vector<16x32xf32>
    %10 = math.erf %9 : vector<16x32xf32>
    %cst_6 = arith.constant 1.000000e+00 : f32
    %11 = vector.broadcast %cst_6 : f32 to vector<16x32xf32>
    %12 = arith.addf %11, %10 : vector<16x32xf32>
    %cst_7 = arith.constant 5.000000e-01 : f32
    %13 = vector.broadcast %cst_7 : f32 to vector<16x32xf32>
    %14 = arith.mulf %13, %12 : vector<16x32xf32>
    %15 = arith.mulf %7, %14 : vector<16x32xf32>
    %cst_8 = arith.constant dense<0.000000e+00> : vector<16xf32>
    %16 = vector.multi_reduction <add>, %15, %cst_8 [1] : vector<16x32xf32> to vector<16xf32>
    %17 = vector.shape_cast %16 : vector<16xf32> to vector<16x1xf32>
    %cst_9 = arith.constant 3.200000e+01 : f32
    %18 = vector.broadcast %cst_9 : f32 to vector<16x1xf32>
    %19 = arith.divf %17, %18 : vector<16x1xf32>
    %20 = vector.broadcast %19 : vector<16x1xf32> to vector<16x32xf32>
    %21 = arith.subf %15, %20 : vector<16x32xf32>
    %22 = arith.mulf %21, %21 : vector<16x32xf32>
    %cst_10 = arith.constant dense<0.000000e+00> : vector<16xf32>
    %23 = vector.multi_reduction <add>, %22, %cst_10 [1] : vector<16x32xf32> to vector<16xf32>
    %24 = vector.shape_cast %23 : vector<16xf32> to vector<16x1xf32>
    %cst_11 = arith.constant 3.200000e+01 : f32
    %25 = vector.broadcast %cst_11 : f32 to vector<16x1xf32>
    %26 = arith.divf %24, %25 : vector<16x1xf32>
    %27 = vector.broadcast %19 : vector<16x1xf32> to vector<16x32xf32>
    %28 = arith.subf %15, %27 : vector<16x32xf32>
    %cst_12 = arith.constant 9.99999996E-13 : f32
    %29 = vector.broadcast %cst_12 : f32 to vector<16x1xf32>
    %30 = arith.addf %26, %29 : vector<16x1xf32>
    %31 = math.rsqrt %30 : vector<16x1xf32>
    %32 = vector.broadcast %31 : vector<16x1xf32> to vector<16x32xf32>
    %33 = arith.mulf %28, %32 : vector<16x32xf32>
    %34 = vector.extract_strided_slice %4 {offsets = [1, 0], sizes = [1, 32], strides = [1, 1]} : vector<3x32xf32> to vector<1x32xf32>
    %35 = vector.broadcast %34 : vector<1x32xf32> to vector<16x32xf32>
    %36 = arith.mulf %33, %35 : vector<16x32xf32>
    %37 = vector.extract_strided_slice %4 {offsets = [2, 0], sizes = [1, 32], strides = [1, 1]} : vector<3x32xf32> to vector<1x32xf32>
    %38 = vector.broadcast %37 : vector<1x32xf32> to vector<16x32xf32>
    %39 = arith.addf %36, %38 : vector<16x32xf32>
    %40 = arith.truncf %39 : vector<16x32xf32> to vector<16x32xbf16>
    %c0_13 = arith.constant 0 : index
    %c0_14 = arith.constant 0 : index
    %41 = vector.load %arg4[%c0_13, %c0_14] : memref<32x768xbf16, #tpu.memory_space<vmem>>, vector<32x768xbf16>
    %cst_15 = arith.constant dense<0.000000e+00> : vector<16x768xf32>
    %42 = tpu.matmul %40, %41, %cst_15 {dimension_numbers = #tpu.dot_dimension_numbers<[1], [0], [0], [1], [0, 0, 1, 1], [], []>} : vector<16x32xbf16>, vector<32x768xbf16>, vector<16x768xf32> -> vector<16x768xf32>
    %c0_16 = arith.constant 0 : index
    %c0_17 = arith.constant 0 : index
    %43 = vector.load %arg5[%c0_16, %c0_17] : memref<1x768xf32, #tpu.memory_space<vmem>>, vector<1x768xf32>
    %44 = vector.broadcast %43 : vector<1x768xf32> to vector<16x768xf32>
    %45 = arith.addf %42, %44 : vector<16x768xf32>
    %c0_18 = arith.constant 0 : index
    %c0_19 = arith.constant 0 : index
    %46 = vector.load %arg6[%c0_18, %c0_19] : memref<16x768xf32, #tpu.memory_space<vmem>>, vector<16x768xf32>
    tpu.vector_store %arg6[%c0_18, %c0_19], %45 {strides = array<i32>} : memref<16x768xf32, #tpu.memory_space<vmem>>, vector<16x768xf32>,
    return
  }
  func.func @transform_0(%arg0: i32) -> (i32, i32) {
    %c0_i32 = arith.constant 0 : i32
    %c0_i32_0 = arith.constant 0 : i32
    return %arg0, %c0_i32 : i32, i32
  }
  func.func @transform_1(%arg0: i32) -> (i32, i32) {
    %c0_i32 = arith.constant 0 : i32
    %c0_i32_0 = arith.constant 0 : i32
    %c0_i32_1 = arith.constant 0 : i32
    return %c0_i32, %c0_i32_0 : i32, i32
  }
  func.func @transform_2(%arg0: i32) -> (i32, i32) {
    %c0_i32 = arith.constant 0 : i32
    %c0_i32_0 = arith.constant 0 : i32
    %c0_i32_1 = arith.constant 0 : i32
    return %c0_i32, %c0_i32_0 : i32, i32
  }
  func.func @transform_3(%arg0: i32) -> (i32, i32) {
    %c0_i32 = arith.constant 0 : i32
    %c0_i32_0 = arith.constant 0 : i32
    %c0_i32_1 = arith.constant 0 : i32
    return %c0_i32, %c0_i32_0 : i32, i32
  }
  func.func @transform_4(%arg0: i32) -> (i32, i32) {
    %c0_i32 = arith.constant 0 : i32
    %c0_i32_0 = arith.constant 0 : i32
    %c0_i32_1 = arith.constant 0 : i32
    return %c0_i32, %c0_i32_0 : i32, i32
  }
  func.func @transform_5(%arg0: i32) -> (i32, i32) {
    %c0_i32 = arith.constant 0 : i32
    %c0_i32_0 = arith.constant 0 : i32
    return %arg0, %c0_i32 : i32, i32
  }
}

</mosaic_0001>

<bundles_post_ra>
// kernel: tpu_custom_call.1
= control target key start
LH: loop header
LB: loop body
LE: loop exit
PB: predicated region body
PF: predicated region fallthrough
CT: control target
= control target key end

     0   :  { %10 = vsyncpa [#allocation3], 0  ;;  %s830_s0 = inlined_call_operand.hbm [shape: f32[16,32], index: 0, kind: input, shape index: {}]   ;;  %s831_s1 = inlined_call_operand.hbm [shape: bf16[32,32], index: 1, kind: input, shape index: {}]   ;;  %s832_s2 = inlined_call_operand.hbm [shape: f32[3,32], index: 2, kind: input, shape index: {}]   ;;  %s833_s3 = inlined_call_operand.hbm [shape: bf16[32,768], index: 3, kind: input, shape index: {}]   ;;  %s834_s4 = inlined_call_operand.hbm [shape: f32[1,768], index: 4, kind: input, shape index: {}]   ;;  %s835_s5 = inlined_call_operand.hbm [shape: f32[16,768], index: 5, kind: output, shape index: {}]  }
   0x1   :  { %11 = vsyncpa [#allocation6], 0 }
   0x2   :  { %12 = vsyncpa [#allocation9], 0 }
   0x3   :  { %13 = vsyncpa [#allocation4], 0  ;;  %s686_s18 = smov [#allocation5]   ;;  %s546_s22 = scalar_lea.hbm %s831_s1, 256 }
   0x4   :  { %s31_s19 = sshll.u32 %s686_s18, 4  ;;  %p547_p0 = scmp.ne.s32.totalorder %s831_s1, %s546_s22  ;;  %s32_s19 = int_to_ptr.vmem [resolvable:$true] %s31_s19 }
   0x5   :  { %p550_p1 = scmp.lt.u32.totalorder %s546_s22, %s831_s1 }
   0x7   :  { %p552_p2 = pnand %p550_p1, %p547_p0 }
   0x9   :  { %555 = shalt.err (!%p552_p2)
}
   0xa   :  { %s556_s27 = scalar_lea.vmem %s32_s19, 256  ;;  %p561_p4 = scmp.lt.s32.totalorder %s32_s19, %s32_s19 }
   0xb   :  { %p557_p3 = scmp.ne.s32.totalorder %s32_s19, %s556_s27  ;;  %p562_p5 = scmp.lt.s32.totalorder %s556_s27, %s556_s27 }
   0xd   :  { %p563_p6 = por %p562_p5, %p561_p4 }
   0xf   :  { %p564_p7 = pnand %p563_p6, %p557_p3 }
  0x11   :  { %567 = shalt.err (!%p564_p7)
}
  0x12   :  { %s687_s28 = smov 64   ;;  %s688_s29 = smov 4  }
  0x13   :  { %37 = dma.hbm_to_vmem [thread:$0]  %s831_s1, 256, %s32_s19, [#allocation6], %s687_s28, %s687_s28, %s688_s29  }
  0x14   :  { %s689_s7 = smov [#allocation8]   ;;  %s568_s11 = scalar_lea.hbm %s833_s3, 1536 }
  0x15   :  { %s53_s8 = sshll.u32 %s689_s7, 4  ;;  %p569_p8 = scmp.ne.s32.totalorder %s833_s3, %s568_s11  ;;  %s54_s8 = int_to_ptr.vmem [resolvable:$true] %s53_s8 }
  0x16   :  { %p572_p9 = scmp.lt.u32.totalorder %s568_s11, %s833_s3 }
  0x18   :  { %p574_p10 = pnand %p572_p9, %p569_p8 }
  0x1a   :  { %577 = shalt.err (!%p574_p10)
}
  0x1b   :  { %s578_s16 = scalar_lea.vmem %s54_s8, 1536  ;;  %p583_p12 = scmp.lt.s32.totalorder %s54_s8, %s54_s8 }
  0x1c   :  { %p579_p11 = scmp.ne.s32.totalorder %s54_s8, %s578_s16  ;;  %p584_p13 = scmp.lt.s32.totalorder %s578_s16, %s578_s16 }
  0x1e   :  { %p585_p0 = por %p584_p13, %p583_p12 }
  0x20   :  { %p586_p1 = pnand %p585_p0, %p579_p11 }
  0x22   :  { %589 = shalt.err (!%p586_p1)
}
  0x23   :  { %s690_s1 = smov 384   ;;  %s691_s17 = smov 24  }
  0x24   :  { %59 = dma.hbm_to_vmem [thread:$0]  %s833_s3, 1536, %s54_s8, [#allocation9], %s690_s1, %s690_s1, %s691_s17  }
  0x25   :  { %s692_s20 = smov [#allocation2]   ;;  %s590_s24 = scalar_lea.hbm %s830_s0, 256 }
  0x26   :  { %s19_s21 = sshll.u32 %s692_s20, 4  ;;  %p591_p2 = scmp.ne.s32.totalorder %s830_s0, %s590_s24  ;;  %s20_s21 = int_to_ptr.vmem [resolvable:$true] %s19_s21 }
  0x27   :  { %p594_p3 = scmp.lt.u32.totalorder %s590_s24, %s830_s0 }
  0x29   :  { %p596_p4 = pnand %p594_p3, %p591_p2 }
  0x2b   :  { %599 = shalt.err (!%p596_p4)
}
  0x2c   :  { %s600_s29 = scalar_lea.vmem %s20_s21, 256  ;;  %p605_p6 = scmp.lt.s32.totalorder %s20_s21, %s20_s21 }
  0x2d   :  { %p601_p5 = scmp.ne.s32.totalorder %s20_s21, %s600_s29  ;;  %p606_p7 = scmp.lt.s32.totalorder %s600_s29, %s600_s29 }
  0x2f   :  { %p607_p8 = por %p606_p7, %p605_p6 }
  0x31   :  { %p608_p9 = pnand %p607_p8, %p601_p5 }
  0x33   :  { %611 = shalt.err (!%p608_p9)
}
  0x34   :  { %s693_s3 = smov 128   ;;  %s694_s30 = smov 8  }
  0x35   :  { %25 = dma.hbm_to_vmem [thread:$0]  %s830_s0, 256, %s20_s21, [#allocation3], %s693_s3, %s693_s3, %s694_s30  }
  0x36   :  { %s695_s8 = smov [#allocation7]   ;;  %s696_s10 = smov [#allocation10]  }
  0x37   :  { %s44_s9 = sshll.u32 %s695_s8, 4  ;;  %s66_s11 = sshll.u32 %s696_s10, 4  ;;  %s45_s9 = int_to_ptr.vmem [resolvable:$true] %s44_s9  ;;  %s67_s11 = int_to_ptr.vmem [resolvable:$true] %s66_s11 }
  0x38   :  { %s612_s14 = scalar_lea.hbm %s832_s2, 64 }
  0x39   :  { %p613_p10 = scmp.ne.s32.totalorder %s832_s2, %s612_s14  ;;  %p616_p11 = scmp.lt.u32.totalorder %s612_s14, %s832_s2 }
  0x3b   :  { %p618_p12 = pnand %p616_p11, %p613_p10 }
  0x3d   :  { %621 = shalt.err (!%p618_p12)
}
  0x3e   :  { %s622_s0 = scalar_lea.vmem %s45_s9, 64  ;;  %p627_p0 = scmp.lt.s32.totalorder %s45_s9, %s45_s9 }
  0x3f   :  { %p623_p13 = scmp.ne.s32.totalorder %s45_s9, %s622_s0  ;;  %p628_p1 = scmp.lt.s32.totalorder %s622_s0, %s622_s0 }
  0x41   :  { %p629_p2 = por %p628_p1, %p627_p0 }
  0x43   :  { %p630_p3 = pnand %p629_p2, %p623_p13 }
  0x45   :  { %633 = shalt.err (!%p630_p3)
}
  0x46   :  { %47 = dma.hbm_to_vmem [thread:$0]  %s832_s2, 64, %s45_s9, [#allocation6]  }
  0x47   :  { %s634_s22 = scalar_lea.hbm %s834_s4, 96 }
  0x48   :  { %p635_p4 = scmp.ne.s32.totalorder %s834_s4, %s634_s22  ;;  %p638_p5 = scmp.lt.u32.totalorder %s634_s22, %s834_s4 }
  0x4a   :  { %p640_p6 = pnand %p638_p5, %p635_p4 }
  0x4c   :  { %643 = shalt.err (!%p640_p6)
}
  0x4d   :  { %s644_s27 = scalar_lea.vmem %s67_s11, 96  ;;  %p649_p8 = scmp.lt.s32.totalorder %s67_s11, %s67_s11 }
  0x4e   :  { %p645_p7 = scmp.ne.s32.totalorder %s67_s11, %s644_s27  ;;  %p650_p9 = scmp.lt.s32.totalorder %s644_s27, %s644_s27 }
  0x50   :  { %p651_p10 = por %p650_p9, %p649_p8 }
  0x52   :  { %p652_p11 = pnand %p651_p10, %p645_p7 }
  0x54   :  { %655 = shalt.err (!%p652_p11)
}
  0x55   :  { %69 = dma.hbm_to_vmem [thread:$0]  %s834_s4, 96, %s67_s11, [#allocation9]  }
  0x56   :  { %678 = dma.done.wait [#allocation3], 256  }
  0x57   :  { %679 = vsyncadd [#allocation3], 4294967040 }
  0x58   :  { %680 = dma.done.wait [#allocation6], 320  }
  0x59   :  { %681 = vsyncadd [#allocation6], 4294966976 }
  0x5a   :  { %682 = dma.done.wait [#allocation9], 1632  }
  0x5b   :  { %683 = vsyncadd [#allocation9], 4294965664  ;;  %v697_v0 = vmov 0.0   ;;  %vm698_vm0 = vmmov 0   ;;  %v518_v1 = vld [vmem:[#allocation5] sm:$0xff]   ;;  %v519_v2 = vld [vmem:[#allocation5 + $0x8] sm:$0xff]   ;;  %v94_v6 = vlaneseq }
  0x5c   :  { %493 = vmatprep.subr.bf16.mxu0 %v697_v0  ;;  %497 = vmatprep.mubr.msk.bf16.mxu0 %vm698_vm0, %v697_v0  ;;  %v86_v3 = vld [vmem:[#allocation2] sm:$0xff]  ;;  %v87_v4 = vld [vmem:[#allocation2 + $0x8] sm:$0xff]  ;;  %vm110_vm1 = vcmask 261120   ;;  %v526_v43 = vld [vmem:[#allocation8 + $0x34] ss:$24 sps:$4 sm:$0xff]   ;;  %v699_v47 = vmov 0  }
  0x5d   :  { %494 = vmatpush3.bf16.msra.mxu0 %v518_v1  ;;  %v88_v5 = vpack.c.bf16 %v87_v4, %v86_v3  ;;  %v794_v7 = vshrl.u32 %v94_v6, 7  ;;  %v797_v9 = vld [vmem:[#allocation7] sm:$0x7]  ;;  %v525_v40 = vld [vmem:[#allocation8 + $0xc] ss:$24 sps:$4 sm:$0xff]   ;;  %344 = vmatprep.mubr.bf16.mxu1 %v699_v47  ;;  %s700_s4 = smov [#allocation11]  }
  0x5e   :  { %495 = vmatprep.subr.bf16.mxu0 %v697_v0  ;;  %v520_v39 = vld [vmem:[#allocation8 + $0x4] ss:$24 sps:$4 sm:$0xff]   ;;  %v522_v41 = vld [vmem:[#allocation8] ss:$24 sps:$4 sm:$0xff]   ;;  %v528_v44 = vld [vmem:[#allocation8 + $0x30] ss:$24 sps:$4 sm:$0xff]  }
  0x5f   :  { %v96_v8 = vsub.s32 0, %v794_v7  ;;  %v523_v42 = vld [vmem:[#allocation8 + $0x8] ss:$24 sps:$4 sm:$0xff]   ;;  %312 = vmatprep.subr.bf16.mxu1 %v520_v39  ;;  %v529_v45 = vld [vmem:[#allocation8 + $0x38] ss:$24 sps:$4 sm:$0xff]   ;;  %v194_v55 = vsub.s32 1, %v794_v7 }
  0x60   :  { %313 = vmatpush1.bf16.msra.mxu1 %v522_v41  ;;  %v531_v46 = vld [vmem:[#allocation8 + $0x3c] ss:$24 sps:$4 sm:$0xff]   ;;  %v200_v58 = vsub.s32 2, %v794_v7  ;;  %v532_v3 = vld [vmem:[#allocation8 + $0x10] ss:$24 sps:$4 sm:$0xff]   ;;  %s458_s29 = sshll.u32 %s700_s4, 4  ;;  %s459_s29 = int_to_ptr.vmem [resolvable:$true] %s458_s29 }
  0x61   :  { %496 = vmatpush3.bf16.msra.mxu0 %v519_v2  ;;  %v97_v10 = vrot.slane %v797_v9, %v96_v8  ;;  %314 = vmatprep.subr.bf16.mxu1 %v526_v43  ;;  %v534_v48 = vld [vmem:[#allocation8 + $0x14] ss:$24 sps:$4 sm:$0xff]   ;;  %v195_v57 = vrot.slane %v797_v9, %v194_v55  ;;  %v535_v6 = vld [vmem:[#allocation8 + $0x40] ss:$24 sps:$4 sm:$0xff]   ;;  %s656_s3 = scalar_lea.vmem %s459_s29, 1536  ;;  %p661_p13 = scmp.lt.s32.totalorder %s459_s29, %s459_s29 }
  0x62   :  { %355 = vmatprep.subr.bf16.mxu0 %v525_v40  ;;  %v201_v61 = vrot.slane %v797_v9, %v200_v58  ;;  %v217_v9 = vld [vmem:[#allocation10] sm:$0x3f]  ;;  %p657_p12 = scmp.ne.s32.totalorder %s459_s29, %s656_s3  ;;  %p662_p0 = scmp.lt.s32.totalorder %s656_s3, %s656_s3 }
  0x64   :  { %498 = vmatmul.mubr.msk.bf16.vlgmr.msra.gmra.mrb[0].mxu0 %vm110_vm1, %v88_v5  ;;  %315 = vmatpush1.bf16.msra.mxu1 %v528_v44  ;;  %v537_v5 = vld [vmem:[#allocation8 + $0x44] ss:$24 sps:$4 sm:$0xff]   ;;  %p663_p1 = por %p662_p0, %p661_p13 }
  0x65   :  { %356 = vmatpush1.bf16.msra.mxu0 %v523_v42  ;;  %387 = vmatprep.mubr.bf16.mxu0 %v699_v47 }
  0x66   :  { %357 = vmatprep.subr.bf16.mxu0 %v531_v46  ;;  %398 = vmatprep.subr.bf16.mxu1 %v534_v48  ;;  %p664_p2 = pnand %p663_p1, %p657_p12 }
  0x69   :  { %358 = vmatpush1.bf16.msra.mxu0 %v529_v45 }
 0x137   :  { %v148_v11 = vpop.f32.mrb[0].mxu0 }
 0x138   :  { %v149_v12 = vadd.f32 %v148_v11, %v97_v10  ;;  %v499_v13 = vpop.f32.mrb[1].mxu0  ;;  %v222_v11 = vrot.slane %v217_v9, %v96_v8 }
 0x139   :  { %v151_v14 = vpop.f32.mrb[2].mxu0  ;;  %v226_v13 = vrot.slane %v217_v9, %v194_v55 }
 0x13a   :  { %v155_v15 = vmul.f32 0.70710677, %v149_v12  ;;  %v152_v16 = vadd.f32 %v151_v14, %v97_v10  ;;  %v500_v17 = vpop.f32.mrb[3].mxu0  ;;  %v233_v10 = vsub.s32 3, %v794_v7 }
 0x13c   :  { %538 = verf.f32 %v155_v15  ;;  %v156_v18 = vmul.f32 0.70710677, %v152_v16  ;;  %v234_v14 = vrot.slane %v217_v9, %v233_v10 }
 0x13e   :  { %540 = verf.f32 %v156_v18 }
 0x146   :  { %v539_v19 = vpop.eup %538 }
 0x147   :  { %v159_v20 = vadd.f32 1.0, %v539_v19 }
 0x148   :  { %v541_v21 = vpop.eup %540 }
 0x149   :  { %v161_v22 = vmul.f32 0.5, %v159_v20  ;;  %v160_v23 = vadd.f32 1.0, %v541_v21  ;;  %v237_v21 = vsub.s32 4, %v794_v7 }
 0x14b   :  { %v163_v24 = vmul.f32 %v161_v22, %v149_v12  ;;  %v162_v25 = vmul.f32 0.5, %v160_v23  ;;  %v230_v12 = vrot.slane %v217_v9, %v200_v58 }
 0x14d   :  { %v165_v26 = vsel %vm110_vm1, %v163_v24, 0.0  ;;  %v164_v27 = vmul.f32 %v162_v25, %v152_v16 }
 0x14e   :  { %166 = vadd.xlane.f32.xlu0 %v165_v26  ;;  %v241_v26 = vsub.s32 5, %v794_v7 }
 0x14f   :  { %v168_v28 = vsel %vm110_vm1, %v164_v27, 0.0 }
 0x152   :  { %169 = vadd.xlane.f32.xlu0 %v168_v28 }
 0x1db   :  { %v167_v29 = vpop.xlane.xlu0 %166 }
 0x1dc   :  { %v172_v30 = vmul.f32 0.03125, %v167_v29 }
 0x1de   :  { %v174_v31 = vsub.f32 %v163_v24, %v172_v30 }
 0x1df   :  { %v170_v32 = vpop.xlane.xlu0 %169 }
 0x1e0   :  { %v173_v33 = vmul.f32 0.03125, %v170_v32  ;;  %v176_v34 = vmul.f32 %v174_v31, %v174_v31  ;;  %v238_v32 = vrot.slane %v217_v9, %v237_v21 }
 0x1e2   :  { %v175_v35 = vsub.f32 %v164_v27, %v173_v33  ;;  %v178_v36 = vsel %vm110_vm1, %v176_v34, 0.0  ;;  %v242_v33 = vrot.slane %v217_v9, %v241_v26 }
 0x1e3   :  { %179 = vadd.xlane.f32.xlu1 %v178_v36 }
 0x1e4   :  { %v177_v37 = vmul.f32 %v175_v35, %v175_v35 }
 0x1e6   :  { %v181_v38 = vsel %vm110_vm1, %v177_v37, 0.0 }
 0x1e7   :  { %182 = vadd.xlane.f32.xlu1 %v181_v38 }
 0x270   :  { %v180_v49 = vpop.xlane.xlu1 %179 }
 0x271   :  { %v184_v50 = vmul.f32 0.03125, %v180_v49 }
 0x273   :  { %v186_v51 = vadd.f32 1e-12, %v184_v50 }
 0x274   :  { %v183_v52 = vpop.xlane.xlu1 %182 }
 0x275   :  { %542 = vrsqrt.f32 %v186_v51  ;;  %v185_v53 = vmul.f32 0.03125, %v183_v52 }
 0x277   :  { %v187_v54 = vadd.f32 1e-12, %v185_v53 }
 0x279   :  { %544 = vrsqrt.f32 %v187_v54 }
 0x27f   :  { %v543_v56 = vpop.eup %542 }
 0x280   :  { %v190_v59 = vmul.f32 %v543_v56, %v174_v31 }
 0x282   :  { %v196_v63 = vmul.f32 %v195_v57, %v190_v59 }
 0x283   :  { %v545_v60 = vpop.eup %544 }
 0x284   :  { %v191_v62 = vmul.f32 %v545_v60, %v175_v35  ;;  %v202_v1 = vadd.f32 %v201_v61, %v196_v63 }
 0x286   :  { %v197_v0 = vmul.f32 %v195_v57, %v191_v62 }
 0x288   :  { %v203_v2 = vadd.f32 %v201_v61, %v197_v0 }
 0x28a   :  { %v204_v4 = vpack.c.bf16 %v203_v2, %v202_v1 }
 0x28c   :  { %487 = vmatmul.mubr.msk.bf16.vlgmr.msra.gmra.mrb[0].mxu1 %vm110_vm1, %v204_v4  ;;  %488 = vmatmul.mubr.msk.bf16.vlgmr.msra.gmra.mrb[4].mxu0 %vm110_vm1, %v204_v4 }
 0x28d   :  { %399 = vmatpush1.bf16.msra.mxu1 %v532_v3  ;;  %430 = vmatprep.mubr.bf16.mxu1 %v699_v47 }
 0x28e   :  { %400 = vmatprep.subr.bf16.mxu1 %v537_v5 }
 0x291   :  { %401 = vmatpush1.bf16.msra.mxu1 %v535_v6 }
 0x294   :  { %489 = vmatmul.mubr.msk.bf16.vlgmr.msra.gmra.mrb[4].mxu1 %vm110_vm1, %v204_v4 }
 0x35f   :  { %v346_v15 = vpop.f32.mrb[0].mxu1  ;;  %v389_v16 = vpop.f32.mrb[4].mxu0 }
 0x360   :  { %v347_v17 = vadd.f32 %v346_v15, %v222_v11  ;;  %v390_v18 = vadd.f32 %v389_v16, %v230_v12  ;;  %v348_v19 = vpop.f32.mrb[1].mxu1  ;;  %v391_v20 = vpop.f32.mrb[5].mxu0 }
 0x361   :  { %v349_v22 = vadd.f32 %v348_v19, %v226_v13  ;;  %v392_v23 = vadd.f32 %v391_v20, %v234_v14  ;;  %v350_v24 = vpop.f32.mrb[2].mxu1  ;;  %v393_v25 = vpop.f32.mrb[6].mxu0 }
 0x362   :  { %441 = vst [vmem:[#allocation11] sm:$0xff] %v347_v17  ;;  %443 = vst [vmem:[#allocation11 + $0x10] sm:$0xff] %v390_v18  ;;  %v351_v8 = vadd.f32 %v350_v24, %v222_v11  ;;  %v394_v27 = vadd.f32 %v393_v25, %v230_v12  ;;  %v352_v28 = vpop.f32.mrb[3].mxu1  ;;  %v395_v29 = vpop.f32.mrb[7].mxu0 }
 0x363   :  { %442 = vst [vmem:[#allocation11 + $0x8] sm:$0xff] %v349_v22  ;;  %444 = vst [vmem:[#allocation11 + $0x18] sm:$0xff] %v392_v23  ;;  %v353_v30 = vadd.f32 %v352_v28, %v226_v13  ;;  %v396_v31 = vadd.f32 %v395_v29, %v234_v14 }
 0x364   :  { %447 = vst [vmem:[#allocation11 + $0x30] sm:$0xff] %v351_v8  ;;  %449 = vst [vmem:[#allocation11 + $0x40] sm:$0xff] %v394_v27 }
 0x365   :  { %448 = vst [vmem:[#allocation11 + $0x38] sm:$0xff] %v353_v30  ;;  %450 = vst [vmem:[#allocation11 + $0x48] sm:$0xff] %v396_v31 }
 0x367   :  { %v432_v34 = vpop.f32.mrb[4].mxu1 }
 0x368   :  { %v433_v7 = vadd.f32 %v432_v34, %v238_v32  ;;  %v434_v35 = vpop.f32.mrb[5].mxu1 }
 0x369   :  { %v435_v36 = vadd.f32 %v434_v35, %v242_v33  ;;  %v436_v37 = vpop.f32.mrb[6].mxu1 }
 0x36a   :  { %445 = vst [vmem:[#allocation11 + $0x20] sm:$0xff] %v433_v7  ;;  %v437_v38 = vadd.f32 %v436_v37, %v238_v32  ;;  %v438_v39 = vpop.f32.mrb[7].mxu1 }
 0x36b   :  { %446 = vst [vmem:[#allocation11 + $0x28] sm:$0xff] %v435_v36  ;;  %v439_v40 = vadd.f32 %v438_v39, %v242_v33 }
 0x36c   :  { %451 = vst [vmem:[#allocation11 + $0x50] sm:$0xff] %v437_v38 }
 0x36d   :  { %452 = vst [vmem:[#allocation11 + $0x58] sm:$0xff] %v439_v40 }
 0x36e   :  { %667 = shalt.err (!%p664_p2)
}
 0x36f   :  { %s668_s7 = scalar_lea.hbm %s835_s5, 1536 }
 0x370   :  { %p669_p3 = scmp.ne.s32.totalorder %s835_s5, %s668_s7  ;;  %p672_p4 = scmp.lt.u32.totalorder %s668_s7, %s835_s5 }
 0x372   :  { %p674_p5 = pnand %p672_p4, %p669_p3 }
 0x374   :  { %677 = shalt.err (!%p674_p5)
}
 0x375   :  { %s701_s12 = smov 768   ;;  %s702_s13 = smov 48  }
 0x376   :  { %464 = dma.vmem_to_hbm [thread:$0]  %s459_s29, 1536, %s835_s5, [#allocation4], %s701_s12, %s701_s12, %s702_s13  }
 0x377   :  { %684 = dma.done.wait [#allocation4], 1536  }
 0x378   :  { %685 = vsyncadd [#allocation4], 4294965760 }
 0x379   :  { %468 = vsyncpa [#allocation3], 1 }
 0x37a   :  { %469 = vsyncpa [#allocation6], 1 }
 0x37b   :  { %470 = vsyncpa [#allocation9], 1 }
 0x37c   :  { %471 = vsyncpa [#allocation4], 1 }

// kernel: tpu_custom_call.1
= control target key start
LH: loop header
LB: loop body
LE: loop exit
PB: predicated region body
PF: predicated region fallthrough
CT: control target
= control target key end

     0   :  { %10 = vsyncpa [#allocation3], 0  ;;  %s830_s0 = inlined_call_operand.hbm [shape: f32[16,32], index: 0, kind: input, shape index: {}]   ;;  %s831_s1 = inlined_call_operand.hbm [shape: bf16[32,32], index: 1, kind: input, shape index: {}]   ;;  %s832_s2 = inlined_call_operand.hbm [shape: f32[3,32], index: 2, kind: input, shape index: {}]   ;;  %s833_s3 = inlined_call_operand.hbm [shape: bf16[32,768], index: 3, kind: input, shape index: {}]   ;;  %s834_s4 = inlined_call_operand.hbm [shape: f32[1,768], index: 4, kind: input, shape index: {}]   ;;  %s835_s5 = inlined_call_operand.hbm [shape: f32[16,768], index: 5, kind: output, shape index: {}]  }
   0x1   :  { %11 = vsyncpa [#allocation6], 0 }
   0x2   :  { %12 = vsyncpa [#allocation9], 0 }
   0x3   :  { %13 = vsyncpa [#allocation4], 0  ;;  %s686_s18 = smov [#allocation5]   ;;  %s546_s22 = scalar_lea.hbm %s831_s1, 256 }
   0x4   :  { %s31_s19 = sshll.u32 %s686_s18, 4  ;;  %p547_p0 = scmp.ne.s32.totalorder %s831_s1, %s546_s22  ;;  %s32_s19 = int_to_ptr.vmem [resolvable:$true] %s31_s19 }
   0x5   :  { %p550_p1 = scmp.lt.u32.totalorder %s546_s22, %s831_s1 }
   0x7   :  { %p552_p2 = pnand %p550_p1, %p547_p0 }
   0x9   :  { %555 = shalt.err (!%p552_p2)
}
   0xa   :  { %s556_s27 = scalar_lea.vmem %s32_s19, 256  ;;  %p561_p4 = scmp.lt.s32.totalorder %s32_s19, %s32_s19 }
   0xb   :  { %p557_p3 = scmp.ne.s32.totalorder %s32_s19, %s556_s27  ;;  %p562_p5 = scmp.lt.s32.totalorder %s556_s27, %s556_s27 }
   0xd   :  { %p563_p6 = por %p562_p5, %p561_p4 }
   0xf   :  { %p564_p7 = pnand %p563_p6, %p557_p3 }
  0x11   :  { %567 = shalt.err (!%p564_p7)
}
  0x12   :  { %s687_s28 = smov 64   ;;  %s688_s29 = smov 4  }
  0x13   :  { %37 = dma.hbm_to_vmem [thread:$0]  %s831_s1, 256, %s32_s19, [#allocation6], %s687_s28, %s687_s28, %s688_s29  }
  0x14   :  { %s689_s7 = smov [#allocation8]   ;;  %s568_s11 = scalar_lea.hbm %s833_s3, 1536 }
  0x15   :  { %s53_s8 = sshll.u32 %s689_s7, 4  ;;  %p569_p8 = scmp.ne.s32.totalorder %s833_s3, %s568_s11  ;;  %s54_s8 = int_to_ptr.vmem [resolvable:$true] %s53_s8 }
  0x16   :  { %p572_p9 = scmp.lt.u32.totalorder %s568_s11, %s833_s3 }
  0x18   :  { %p574_p10 = pnand %p572_p9, %p569_p8 }
  0x1a   :  { %577 = shalt.err (!%p574_p10)
}
  0x1b   :  { %s578_s16 = scalar_lea.vmem %s54_s8, 1536  ;;  %p583_p12 = scmp.lt.s32.totalorder %s54_s8, %s54_s8 }
  0x1c   :  { %p579_p11 = scmp.ne.s32.totalorder %s54_s8, %s578_s16  ;;  %p584_p13 = scmp.lt.s32.totalorder %s578_s16, %s578_s16 }
  0x1e   :  { %p585_p0 = por %p584_p13, %p583_p12 }
  0x20   :  { %p586_p1 = pnand %p585_p0, %p579_p11 }
  0x22   :  { %589 = shalt.err (!%p586_p1)
}
  0x23   :  { %s690_s1 = smov 384   ;;  %s691_s17 = smov 24  }
  0x24   :  { %59 = dma.hbm_to_vmem [thread:$0]  %s833_s3, 1536, %s54_s8, [#allocation9], %s690_s1, %s690_s1, %s691_s17  }
  0x25   :  { %s692_s20 = smov [#allocation2]   ;;  %s590_s24 = scalar_lea.hbm %s830_s0, 256 }
  0x26   :  { %s19_s21 = sshll.u32 %s692_s20, 4  ;;  %p591_p2 = scmp.ne.s32.totalorder %s830_s0, %s590_s24  ;;  %s20_s21 = int_to_ptr.vmem [resolvable:$true] %s19_s21 }
  0x27   :  { %p594_p3 = scmp.lt.u32.totalorder %s590_s24, %s830_s0 }
  0x29   :  { %p596_p4 = pnand %p594_p3, %p591_p2 }
  0x2b   :  { %599 = shalt.err (!%p596_p4)
}
  0x2c   :  { %s600_s29 = scalar_lea.vmem %s20_s21, 256  ;;  %p605_p6 = scmp.lt.s32.totalorder %s20_s21, %s20_s21 }
  0x2d   :  { %p601_p5 = scmp.ne.s32.totalorder %s20_s21, %s600_s29  ;;  %p606_p7 = scmp.lt.s32.totalorder %s600_s29, %s600_s29 }
  0x2f   :  { %p607_p8 = por %p606_p7, %p605_p6 }
  0x31   :  { %p608_p9 = pnand %p607_p8, %p601_p5 }
  0x33   :  { %611 = shalt.err (!%p608_p9)
}
  0x34   :  { %s693_s3 = smov 128   ;;  %s694_s30 = smov 8  }
  0x35   :  { %25 = dma.hbm_to_vmem [thread:$0]  %s830_s0, 256, %s20_s21, [#allocation3], %s693_s3, %s693_s3, %s694_s30  }
  0x36   :  { %s695_s8 = smov [#allocation7]   ;;  %s696_s10 = smov [#allocation10]  }
  0x37   :  { %s44_s9 = sshll.u32 %s695_s8, 4  ;;  %s66_s11 = sshll.u32 %s696_s10, 4  ;;  %s45_s9 = int_to_ptr.vmem [resolvable:$true] %s44_s9  ;;  %s67_s11 = int_to_ptr.vmem [resolvable:$true] %s66_s11 }
  0x38   :  { %s612_s14 = scalar_lea.hbm %s832_s2, 64 }
  0x39   :  { %p613_p10 = scmp.ne.s32.totalorder %s832_s2, %s612_s14  ;;  %p616_p11 = scmp.lt.u32.totalorder %s612_s14, %s832_s2 }
  0x3b   :  { %p618_p12 = pnand %p616_p11, %p613_p10 }
  0x3d   :  { %621 = shalt.err (!%p618_p12)
}
  0x3e   :  { %s622_s0 = scalar_lea.vmem %s45_s9, 64  ;;  %p627_p0 = scmp.lt.s32.totalorder %s45_s9, %s45_s9 }
  0x3f   :  { %p623_p13 = scmp.ne.s32.totalorder %s45_s9, %s622_s0  ;;  %p628_p1 = scmp.lt.s32.totalorder %s622_s0, %s622_s0 }
  0x41   :  { %p629_p2 = por %p628_p1, %p627_p0 }
  0x43   :  { %p630_p3 = pnand %p629_p2, %p623_p13 }
  0x45   :  { %633 = shalt.err (!%p630_p3)
}
  0x46   :  { %47 = dma.hbm_to_vmem [thread:$0]  %s832_s2, 64, %s45_s9, [#allocation6]  }
  0x47   :  { %s634_s22 = scalar_lea.hbm %s834_s4, 96 }
  0x48   :  { %p635_p4 = scmp.ne.s32.totalorder %s834_s4, %s634_s22  ;;  %p638_p5 = scmp.lt.u32.totalorder %s634_s22, %s834_s4 }
  0x4a   :  { %p640_p6 = pnand %p638_p5, %p635_p4 }
  0x4c   :  { %643 = shalt.err (!%p640_p6)
}
  0x4d   :  { %s644_s27 = scalar_lea.vmem %s67_s11, 96  ;;  %p649_p8 = scmp.lt.s32.totalorder %s67_s11, %s67_s11 }
  0x4e   :  { %p645_p7 = scmp.ne.s32.totalorder %s67_s11, %s644_s27  ;;  %p650_p9 = scmp.lt.s32.totalorder %s644_s27, %s644_s27 }
  0x50   :  { %p651_p10 = por %p650_p9, %p649_p8 }
  0x52   :  { %p652_p11 = pnand %p651_p10, %p645_p7 }
  0x54   :  { %655 = shalt.err (!%p652_p11)
}
  0x55   :  { %69 = dma.hbm_to_vmem [thread:$0]  %s834_s4, 96, %s67_s11, [#allocation9]  }
  0x56   :  { %678 = dma.done.wait [#allocation3], 256  }
  0x57   :  { %679 = vsyncadd [#allocation3], 4294967040 }
  0x58   :  { %680 = dma.done.wait [#allocation6], 320  }
  0x59   :  { %681 = vsyncadd [#allocation6], 4294966976 }
  0x5a   :  { %682 = dma.done.wait [#allocation9], 1632  }
  0x5b   :  { %683 = vsyncadd [#allocation9], 4294965664  ;;  %v697_v0 = vmov 0.0   ;;  %vm698_vm0 = vmmov 0   ;;  %v518_v1 = vld [vmem:[#allocation5] sm:$0xff]   ;;  %v519_v2 = vld [vmem:[#allocation5 + $0x8] sm:$0xff]   ;;  %v94_v6 = vlaneseq }
  0x5c   :  { %493 = vmatprep.subr.bf16.mxu0 %v697_v0  ;;  %497 = vmatprep.mubr.msk.bf16.mxu0 %vm698_vm0, %v697_v0  ;;  %v86_v3 = vld [vmem:[#allocation2] sm:$0xff]  ;;  %v87_v4 = vld [vmem:[#allocation2 + $0x8] sm:$0xff]  ;;  %vm110_vm1 = vcmask 261120   ;;  %v526_v43 = vld [vmem:[#allocation8 + $0x34] ss:$24 sps:$4 sm:$0xff]   ;;  %v699_v47 = vmov 0  }
  0x5d   :  { %494 = vmatpush3.bf16.msra.mxu0 %v518_v1  ;;  %v88_v5 = vpack.c.bf16 %v87_v4, %v86_v3  ;;  %v794_v7 = vshrl.u32 %v94_v6, 7  ;;  %v797_v9 = vld [vmem:[#allocation7] sm:$0x7]  ;;  %v525_v40 = vld [vmem:[#allocation8 + $0xc] ss:$24 sps:$4 sm:$0xff]   ;;  %344 = vmatprep.mubr.bf16.mxu1 %v699_v47  ;;  %s700_s4 = smov [#allocation11]  }
  0x5e   :  { %495 = vmatprep.subr.bf16.mxu0 %v697_v0  ;;  %v520_v39 = vld [vmem:[#allocation8 + $0x4] ss:$24 sps:$4 sm:$0xff]   ;;  %v522_v41 = vld [vmem:[#allocation8] ss:$24 sps:$4 sm:$0xff]   ;;  %v528_v44 = vld [vmem:[#allocation8 + $0x30] ss:$24 sps:$4 sm:$0xff]  }
  0x5f   :  { %v96_v8 = vsub.s32 0, %v794_v7  ;;  %v523_v42 = vld [vmem:[#allocation8 + $0x8] ss:$24 sps:$4 sm:$0xff]   ;;  %312 = vmatprep.subr.bf16.mxu1 %v520_v39  ;;  %v529_v45 = vld [vmem:[#allocation8 + $0x38] ss:$24 sps:$4 sm:$0xff]   ;;  %v194_v55 = vsub.s32 1, %v794_v7 }
  0x60   :  { %313 = vmatpush1.bf16.msra.mxu1 %v522_v41  ;;  %v531_v46 = vld [vmem:[#allocation8 + $0x3c] ss:$24 sps:$4 sm:$0xff]   ;;  %v200_v58 = vsub.s32 2, %v794_v7  ;;  %v532_v3 = vld [vmem:[#allocation8 + $0x10] ss:$24 sps:$4 sm:$0xff]   ;;  %s458_s29 = sshll.u32 %s700_s4, 4  ;;  %s459_s29 = int_to_ptr.vmem [resolvable:$true] %s458_s29 }
  0x61   :  { %496 = vmatpush3.bf16.msra.mxu0 %v519_v2  ;;  %v97_v10 = vrot.slane %v797_v9, %v96_v8  ;;  %314 = vmatprep.subr.bf16.mxu1 %v526_v43  ;;  %v534_v48 = vld [vmem:[#allocation8 + $0x14] ss:$24 sps:$4 sm:$0xff]   ;;  %v195_v57 = vrot.slane %v797_v9, %v194_v55  ;;  %v535_v6 = vld [vmem:[#allocation8 + $0x40] ss:$24 sps:$4 sm:$0xff]   ;;  %s656_s3 = scalar_lea.vmem %s459_s29, 1536  ;;  %p661_p13 = scmp.lt.s32.totalorder %s459_s29, %s459_s29 }
  0x62   :  { %355 = vmatprep.subr.bf16.mxu0 %v525_v40  ;;  %v201_v61 = vrot.slane %v797_v9, %v200_v58  ;;  %v217_v9 = vld [vmem:[#allocation10] sm:$0x3f]  ;;  %p657_p12 = scmp.ne.s32.totalorder %s459_s29, %s656_s3  ;;  %p662_p0 = scmp.lt.s32.totalorder %s656_s3, %s656_s3 }
  0x64   :  { %498 = vmatmul.mubr.msk.bf16.vlgmr.msra.gmra.mrb[0].mxu0 %vm110_vm1, %v88_v5  ;;  %315 = vmatpush1.bf16.msra.mxu1 %v528_v44  ;;  %v537_v5 = vld [vmem:[#allocation8 + $0x44] ss:$24 sps:$4 sm:$0xff]   ;;  %p663_p1 = por %p662_p0, %p661_p13 }
  0x65   :  { %356 = vmatpush1.bf16.msra.mxu0 %v523_v42  ;;  %387 = vmatprep.mubr.bf16.mxu0 %v699_v47 }
  0x66   :  { %357 = vmatprep.subr.bf16.mxu0 %v531_v46  ;;  %398 = vmatprep.subr.bf16.mxu1 %v534_v48  ;;  %p664_p2 = pnand %p663_p1, %p657_p12 }
  0x69   :  { %358 = vmatpush1.bf16.msra.mxu0 %v529_v45 }
 0x137   :  { %v148_v11 = vpop.f32.mrb[0].mxu0 }
 0x138   :  { %v149_v12 = vadd.f32 %v148_v11, %v97_v10  ;;  %v499_v13 = vpop.f32.mrb[1].mxu0  ;;  %v222_v11 = vrot.slane %v217_v9, %v96_v8 }
 0x139   :  { %v151_v14 = vpop.f32.mrb[2].mxu0  ;;  %v226_v13 = vrot.slane %v217_v9, %v194_v55 }
 0x13a   :  { %v155_v15 = vmul.f32 0.70710677, %v149_v12  ;;  %v152_v16 = vadd.f32 %v151_v14, %v97_v10  ;;  %v500_v17 = vpop.f32.mrb[3].mxu0  ;;  %v233_v10 = vsub.s32 3, %v794_v7 }
 0x13c   :  { %538 = verf.f32 %v155_v15  ;;  %v156_v18 = vmul.f32 0.70710677, %v152_v16  ;;  %v234_v14 = vrot.slane %v217_v9, %v233_v10 }
 0x13e   :  { %540 = verf.f32 %v156_v18 }
 0x146   :  { %v539_v19 = vpop.eup %538 }
 0x147   :  { %v159_v20 = vadd.f32 1.0, %v539_v19 }
 0x148   :  { %v541_v21 = vpop.eup %540 }
 0x149   :  { %v161_v22 = vmul.f32 0.5, %v159_v20  ;;  %v160_v23 = vadd.f32 1.0, %v541_v21  ;;  %v237_v21 = vsub.s32 4, %v794_v7 }
 0x14b   :  { %v163_v24 = vmul.f32 %v161_v22, %v149_v12  ;;  %v162_v25 = vmul.f32 0.5, %v160_v23  ;;  %v230_v12 = vrot.slane %v217_v9, %v200_v58 }
 0x14d   :  { %v165_v26 = vsel %vm110_vm1, %v163_v24, 0.0  ;;  %v164_v27 = vmul.f32 %v162_v25, %v152_v16 }
 0x14e   :  { %166 = vadd.xlane.f32.xlu0 %v165_v26  ;;  %v241_v26 = vsub.s32 5, %v794_v7 }
 0x14f   :  { %v168_v28 = vsel %vm110_vm1, %v164_v27, 0.0 }
 0x152   :  { %169 = vadd.xlane.f32.xlu0 %v168_v28 }
 0x1db   :  { %v167_v29 = vpop.xlane.xlu0 %166 }
 0x1dc   :  { %v172_v30 = vmul.f32 0.03125, %v167_v29 }
 0x1de   :  { %v174_v31 = vsub.f32 %v163_v24, %v172_v30 }
 0x1df   :  { %v170_v32 = vpop.xlane.xlu0 %169 }
 0x1e0   :  { %v173_v33 = vmul.f32 0.03125, %v170_v32  ;;  %v176_v34 = vmul.f32 %v174_v31, %v174_v31  ;;  %v238_v32 = vrot.slane %v217_v9, %v237_v21 }
 0x1e2   :  { %v175_v35 = vsub.f32 %v164_v27, %v173_v33  ;;  %v178_v36 = vsel %vm110_vm1, %v176_v34, 0.0  ;;  %v242_v33 = vrot.slane %v217_v9, %v241_v26 }
 0x1e3   :  { %179 = vadd.xlane.f32.xlu1 %v178_v36 }
 0x1e4   :  { %v177_v37 = vmul.f32 %v175_v35, %v175_v35 }
 0x1e6   :  { %v181_v38 = vsel %vm110_vm1, %v177_v37, 0.0 }
 0x1e7   :  { %182 = vadd.xlane.f32.xlu1 %v181_v38 }
 0x270   :  { %v180_v49 = vpop.xlane.xlu1 %179 }
 0x271   :  { %v184_v50 = vmul.f32 0.03125, %v180_v49 }
 0x273   :  { %v186_v51 = vadd.f32 1e-12, %v184_v50 }
 0x274   :  { %v183_v52 = vpop.xlane.xlu1 %182 }
 0x275   :  { %542 = vrsqrt.f32 %v186_v51  ;;  %v185_v53 = vmul.f32 0.03125, %v183_v52 }
 0x277   :  { %v187_v54 = vadd.f32 1e-12, %v185_v53 }
 0x279   :  { %544 = vrsqrt.f32 %v187_v54 }
 0x27f   :  { %v543_v56 = vpop.eup %542 }
 0x280   :  { %v190_v59 = vmul.f32 %v543_v56, %v174_v31 }
 0x282   :  { %v196_v63 = vmul.f32 %v195_v57, %v190_v59 }
 0x283   :  { %v545_v60 = vpop.eup %544 }
 0x284   :  { %v191_v62 = vmul.f32 %v545_v60, %v175_v35  ;;  %v202_v1 = vadd.f32 %v201_v61, %v196_v63 }
 0x286   :  { %v197_v0 = vmul.f32 %v195_v57, %v191_v62 }
 0x288   :  { %v203_v2 = vadd.f32 %v201_v61, %v197_v0 }
 0x28a   :  { %v204_v4 = vpack.c.bf16 %v203_v2, %v202_v1 }
 0x28c   :  { %487 = vmatmul.mubr.msk.bf16.vlgmr.msra.gmra.mrb[0].mxu1 %vm110_vm1, %v204_v4  ;;  %488 = vmatmul.mubr.msk.bf16.vlgmr.msra.gmra.mrb[4].mxu0 %vm110_vm1, %v204_v4 }
 0x28d   :  { %399 = vmatpush1.bf16.msra.mxu1 %v532_v3  ;;  %430 = vmatprep.mubr.bf16.mxu1 %v699_v47 }
 0x28e   :  { %400 = vmatprep.subr.bf16.mxu1 %v537_v5 }
 0x291   :  { %401 = vmatpush1.bf16.msra.mxu1 %v535_v6 }
 0x294   :  { %489 = vmatmul.mubr.msk.bf16.vlgmr.msra.gmra.mrb[4].mxu1 %vm110_vm1, %v204_v4 }
 0x35f   :  { %v346_v15 = vpop.f32.mrb[0].mxu1  ;;  %v389_v16 = vpop.f32.mrb[4].mxu0 }
 0x360   :  { %v347_v17 = vadd.f32 %v346_v15, %v222_v11  ;;  %v390_v18 = vadd.f32 %v389_v16, %v230_v12  ;;  %v348_v19 = vpop.f32.mrb[1].mxu1  ;;  %v391_v20 = vpop.f32.mrb[5].mxu0 }
 0x361   :  { %v349_v22 = vadd.f32 %v348_v19, %v226_v13  ;;  %v392_v23 = vadd.f32 %v391_v20, %v234_v14  ;;  %v350_v24 = vpop.f32.mrb[2].mxu1  ;;  %v393_v25 = vpop.f32.mrb[6].mxu0 }
 0x362   :  { %441 = vst [vmem:[#allocation11] sm:$0xff] %v347_v17  ;;  %443 = vst [vmem:[#allocation11 + $0x10] sm:$0xff] %v390_v18  ;;  %v351_v8 = vadd.f32 %v350_v24, %v222_v11  ;;  %v394_v27 = vadd.f32 %v393_v25, %v230_v12  ;;  %v352_v28 = vpop.f32.mrb[3].mxu1  ;;  %v395_v29 = vpop.f32.mrb[7].mxu0 }
 0x363   :  { %442 = vst [vmem:[#allocation11 + $0x8] sm:$0xff] %v349_v22  ;;  %444 = vst [vmem:[#allocation11 + $0x18] sm:$0xff] %v392_v23  ;;  %v353_v30 = vadd.f32 %v352_v28, %v226_v13  ;;  %v396_v31 = vadd.f32 %v395_v29, %v234_v14 }
 0x364   :  { %447 = vst [vmem:[#allocation11 + $0x30] sm:$0xff] %v351_v8  ;;  %449 = vst [vmem:[#allocation11 + $0x40] sm:$0xff] %v394_v27 }
 0x365   :  { %448 = vst [vmem:[#allocation11 + $0x38] sm:$0xff] %v353_v30  ;;  %450 = vst [vmem:[#allocation11 + $0x48] sm:$0xff] %v396_v31 }
 0x367   :  { %v432_v34 = vpop.f32.mrb[4].mxu1 }
 0x368   :  { %v433_v7 = vadd.f32 %v432_v34, %v238_v32  ;;  %v434_v35 = vpop.f32.mrb[5].mxu1 }
 0x369   :  { %v435_v36 = vadd.f32 %v434_v35, %v242_v33  ;;  %v436_v37 = vpop.f32.mrb[6].mxu1 }
 0x36a   :  { %445 = vst [vmem:[#allocation11 + $0x20] sm:$0xff] %v433_v7  ;;  %v437_v38 = vadd.f32 %v436_v37, %v238_v32  ;;  %v438_v39 = vpop.f32.mrb[7].mxu1 }
 0x36b   :  { %446 = vst [vmem:[#allocation11 + $0x28] sm:$0xff] %v435_v36  ;;  %v439_v40 = vadd.f32 %v438_v39, %v242_v33 }
 0x36c   :  { %451 = vst [vmem:[#allocation11 + $0x50] sm:$0xff] %v437_v38 }
 0x36d   :  { %452 = vst [vmem:[#allocation11 + $0x58] sm:$0xff] %v439_v40 }
 0x36e   :  { %667 = shalt.err (!%p664_p2)
}
 0x36f   :  { %s668_s7 = scalar_lea.hbm %s835_s5, 1536 }
 0x370   :  { %p669_p3 = scmp.ne.s32.totalorder %s835_s5, %s668_s7  ;;  %p672_p4 = scmp.lt.u32.totalorder %s668_s7, %s835_s5 }
 0x372   :  { %p674_p5 = pnand %p672_p4, %p669_p3 }
 0x374   :  { %677 = shalt.err (!%p674_p5)
}
 0x375   :  { %s701_s12 = smov 768   ;;  %s702_s13 = smov 48  }
 0x376   :  { %464 = dma.vmem_to_hbm [thread:$0]  %s459_s29, 1536, %s835_s5, [#allocation4], %s701_s12, %s701_s12, %s702_s13  }
 0x377   :  { %684 = dma.done.wait [#allocation4], 1536  }
 0x378   :  { %685 = vsyncadd [#allocation4], 4294965760 }
 0x379   :  { %468 = vsyncpa [#allocation3], 1 }
 0x37a   :  { %469 = vsyncpa [#allocation6], 1 }
 0x37b   :  { %470 = vsyncpa [#allocation9], 1 }
 0x37c   :  { %471 = vsyncpa [#allocation4], 1 }

</bundles_post_ra>
